<compile_context>
chip_gen: v7x
topology: tpu7x:2x2x1
jax: 0.10.0
libtpu: 0.0.40
codegen_flags: <defaults>
</compile_context>

<pallas_src>
import functools

import jax
import jax.numpy as jnp
from jax.experimental import pallas as pl
from jax.experimental.pallas import tpu as pltpu


def _round_up(x: int, m: int) -> int:
    return ((x + m - 1) // m) * m


def _mlp_kernel(x_ref, w_ref, b_ref, o_ref):
    # x_ref : (TB, Hp)      batch tile, compute dtype (bf16 or f32)
    # w_ref : (Hp, TN)      weight strip, [in, out] layout (pre-transposed)
    # b_ref : (1,  TN)      bias strip, f32
    # o_ref : (TB, TN)      output tile
    y = jnp.dot(x_ref[...], w_ref[...], preferred_element_type=jnp.float32)
    y = y + b_ref[...]
    o_ref[...] = jnp.tanh(y).astype(o_ref.dtype)


def _pick_block_b(B: int) -> int:
    """>=4 grid steps along batch when B allows, multiples of 256 preferred, cap 512."""
    target = max(1, pl.cdiv(B, 4))
    if target >= 256:
        bb = _round_up(target, 256)
    else:
        bb = _round_up(target, 16)       # bf16 sublane packing
    return min(512, bb)


def make_mlp_layer(weight, bias, *, compute_dtype=jnp.bfloat16, out_dtype=None,
                   vmem_budget_bytes=48 * 1024 * 1024):
    """One-time parameter prep + jitted forward closure.

    weight: [H, H] PyTorch nn.Linear layout ([out_features, in_features])
    bias  : [H]
    Returns forward(features[B, H]) -> tanh(features @ weight.T + bias)[B, H].
    """
    H_out, H_in = weight.shape
    assert H_out == H_in, "MLPLayer uses a square hidden->hidden Linear"
    H = H_in
    assert bias.shape == (H,)

    Hp = _round_up(H, 128)                      # lane-dense contraction (K) dim
    cbytes = jnp.dtype(compute_dtype).itemsize

    # ---- choose the output (N) tile so the worst-case footprint fits the budget.
    def _footprint(bn, bb, obytes):
        w_bufs = 1 if bn >= Hp else 2           # resident strip -> single buffer
        return (2 * bb * Hp * cbytes            # x tile, double buffered
                + w_bufs * Hp * bn * cbytes     # weight strip
                + 2 * bn * 4                    # bias (tiny)
                + 2 * bb * bn * obytes)         # out tile, double buffered

    block_n = Hp
    while block_n > 128:
        if _footprint(block_n, 512, 4) <= vmem_budget_bytes:   # size for worst case
            break
        block_n = max(128, _round_up(block_n // 2, 128))
    Np = _round_up(Hp, block_n)                 # padded output (N) dim

    # ---- one-time prep: transpose to [in, out], zero-pad, cast to compute dtype.
    w_p = jnp.zeros((Hp, Np), compute_dtype)
    w_p = w_p.at[:H, :H].set(jnp.asarray(weight).T.astype(compute_dtype))
    b_p = jnp.zeros((1, Np), jnp.float32)
    b_p = b_p.at[0, :H].set(jnp.asarray(bias).astype(jnp.float32))

    @jax.jit
    def forward(features):
        B, Hf = features.shape
        assert Hf == H
        out_dt = jnp.dtype(out_dtype) if out_dtype is not None else features.dtype
        obytes = out_dt.itemsize

        block_b = _pick_block_b(B)
        Bp = _round_up(B, block_b)

        x = features
        if Hp != H or Bp != B:
            x = jnp.pad(x, ((0, Bp - B), (0, Hp - H)))
        x = x.astype(compute_dtype)

        n_tiles = Np // block_n
        b_tiles = Bp // block_b
        grid = (n_tiles, b_tiles)               # weight varies on the OUTER axis only

        x_spec = pl.BlockSpec((block_b, Hp), lambda j, i: (i, 0))
        if n_tiles == 1:
            # Fully resident weight/bias: single buffer (review item #1).
            w_spec = pl.BlockSpec((Hp, block_n), lambda j, i: (0, j),
                                  pipeline_mode=pl.Buffered(1))
            b_spec = pl.BlockSpec((1, block_n), lambda j, i: (0, j),
                                  pipeline_mode=pl.Buffered(1))
        else:
            # Streaming weight strips: keep default double-buffering.
            w_spec = pl.BlockSpec((Hp, block_n), lambda j, i: (0, j))
            b_spec = pl.BlockSpec((1, block_n), lambda j, i: (0, j))
        o_spec = pl.BlockSpec((block_b, block_n), lambda j, i: (i, j))

        # VMEM limit sized to actual need (+headroom), never the whole v7x core.
        footprint = _footprint(block_n, block_b, obytes)
        vmem_limit = int(min(56 * 1024 * 1024,
                             max(16 * 1024 * 1024,
                                 footprint + max(footprint // 4, 4 * 1024 * 1024))))

        out = pl.pallas_call(
            _mlp_kernel,
            out_shape=jax.ShapeDtypeStruct((Bp, Np), out_dt),
            grid_spec=pltpu.PrefetchScalarGridSpec(
                num_scalar_prefetch=0,
                grid=grid,
                in_specs=[x_spec, w_spec, b_spec],
                out_specs=o_spec,
            ),
            compiler_params=pltpu.CompilerParams(
                dimension_semantics=("parallel", "parallel"),
                vmem_limit_bytes=vmem_limit,
            ),
        )(x, w_p, b_p)

        return out[:B, :H]

    return forward


# Convenience one-shot wrapper (keeps the old call signature for tests).
def mlp_layer(features, weight, bias, *, compute_dtype=jnp.bfloat16, out_dtype=None):
    fwd = make_mlp_layer(weight, bias, compute_dtype=compute_dtype, out_dtype=out_dtype)
    return fwd(features)


if __name__ == "__main__":
    B, H = 8, 32                       # small demo shapes: batch=8, hidden=32
    key = jax.random.PRNGKey(0)
    kx, kw, kb = jax.random.split(key, 3)

    features = jax.random.normal(kx, (B, H), dtype=jnp.float32)
    # Deterministic synthetic parameters (not a checkpoint); PyTorch [out, in] layout.
    weight = jax.random.normal(kw, (H, H), dtype=jnp.float32) * 0.02
    bias = jax.random.normal(kb, (H,), dtype=jnp.float32) * 0.02

    ref = jnp.tanh(features @ weight.T + bias)

    # Full-precision path: tight tolerance against the reference.
    fwd_f32 = make_mlp_layer(weight, bias, compute_dtype=jnp.float32)
    out_f32 = fwd_f32(features)
    jax.block_until_ready(out_f32)
    assert out_f32.shape == (B, H)
    assert jnp.allclose(out_f32, ref, atol=1e-5, rtol=1e-5)

    # Default MXU-native path: bf16 operands prepped once, f32 accumulation.
    fwd_bf16 = make_mlp_layer(weight, bias)      # compute_dtype=bf16
    out_bf16 = fwd_bf16(features)
    jax.block_until_ready(out_bf16)
    assert out_bf16.shape == (B, H)
    assert jnp.allclose(out_bf16, ref, atol=2e-2, rtol=2e-2)

    print("KERNEL_OK")
</pallas_src>

<mosaic_0001>
module attributes {stable_mosaic.version = 11 : i64} {
  func.func @_mlp_kernel(%arg0: i32, %arg1: i32, %arg2: memref<16x128xf32, #tpu.memory_space<vmem>>, %arg3: memref<128x128xf32, #tpu.memory_space<vmem>>, %arg4: memref<1x128xf32, #tpu.memory_space<vmem>>, %arg5: memref<16x128xf32, #tpu.memory_space<vmem>>) attributes {dimension_semantics = [#tpu.dimension_semantics<parallel>, #tpu.dimension_semantics<parallel>], iteration_bounds = array<i64: 1, 1>, scalar_prefetch = 0 : i64, scratch_operands = 0 : i64, tpu.core_type = #tpu.core_type<tc>, window_params = [{transform_indices = @transform_0, window_bounds = array<i64: 16, 128>}, {pipeline_mode = #tpu.pipeline_mode<synchronous>, transform_indices = @transform_1, window_bounds = array<i64: 128, 128>}, {pipeline_mode = #tpu.pipeline_mode<synchronous>, transform_indices = @transform_2, window_bounds = array<i64: 1, 128>}, {transform_indices = @transform_3, window_bounds = array<i64: 16, 128>}]} {
    %c0 = arith.constant 0 : index
    %c0_0 = arith.constant 0 : index
    %0 = vector.load %arg2[%c0, %c0_0] : memref<16x128xf32, #tpu.memory_space<vmem>>, vector<16x128xf32>
    %c0_1 = arith.constant 0 : index
    %c0_2 = arith.constant 0 : index
    %1 = vector.load %arg3[%c0_1, %c0_2] : memref<128x128xf32, #tpu.memory_space<vmem>>, vector<128x128xf32>
    %cst = arith.constant dense<0.000000e+00> : vector<16x128xf32>
    %2 = tpu.matmul %0, %1, %cst {dimension_numbers = #tpu.dot_dimension_numbers<[1], [0], [0], [1], [0, 0, 1, 1], [], []>} : vector<16x128xf32>, vector<128x128xf32>, vector<16x128xf32> -> vector<16x128xf32>
    %c0_3 = arith.constant 0 : index
    %c0_4 = arith.constant 0 : index
    %3 = vector.load %arg4[%c0_3, %c0_4] : memref<1x128xf32, #tpu.memory_space<vmem>>, vector<1x128xf32>
    %4 = vector.broadcast %3 : vector<1x128xf32> to vector<16x128xf32>
    %5 = arith.addf %2, %4 : vector<16x128xf32>
    %6 = math.tanh %5 : vector<16x128xf32>
    %c0_5 = arith.constant 0 : index
    %c0_6 = arith.constant 0 : index
    %7 = vector.load %arg5[%c0_5, %c0_6] : memref<16x128xf32, #tpu.memory_space<vmem>>, vector<16x128xf32>
    tpu.vector_store %arg5[%c0_5, %c0_6], %6 {strides = array<i32>} : memref<16x128xf32, #tpu.memory_space<vmem>>, vector<16x128xf32>,
    return
  }
  func.func @transform_0(%arg0: i32, %arg1: i32) -> (i32, i32) {
    %c0_i32 = arith.constant 0 : i32
    %c0_i32_0 = arith.constant 0 : i32
    return %arg1, %c0_i32 : i32, i32
  }
  func.func @transform_1(%arg0: i32, %arg1: i32) -> (i32, i32) {
    %c0_i32 = arith.constant 0 : i32
    %c0_i32_0 = arith.constant 0 : i32
    return %c0_i32, %arg0 : i32, i32
  }
  func.func @transform_2(%arg0: i32, %arg1: i32) -> (i32, i32) {
    %c0_i32 = arith.constant 0 : i32
    %c0_i32_0 = arith.constant 0 : i32
    return %c0_i32, %arg0 : i32, i32
  }
  func.func @transform_3(%arg0: i32, %arg1: i32) -> (i32, i32) {
    %c0_i32 = arith.constant 0 : i32
    return %arg1, %arg0 : i32, i32
  }
}

</mosaic_0001>

<bundles_post_ra>
// kernel: forward.1
= control target key start
LH: loop header
LB: loop body
LE: loop exit
PB: predicated region body
PF: predicated region fallthrough
CT: control target
= control target key end

     0   :  { %8 = vsyncpa [#allocation3], 0  ;;  %s254_s12 = smov [#allocation2]   ;;  %s304_s0 = inlined_call_operand.vmem [shape: f32[16,128], index: 0, kind: input, shape index: {}]   ;;  %s305_s1 = inlined_call_operand.hbm [shape: f32[128,128], index: 1, kind: input, shape index: {}]   ;;  %s306_s2 = inlined_call_operand.vmem [shape: f32[1,128], index: 2, kind: input, shape index: {}]   ;;  %s307_s3 = inlined_call_operand.vmem [shape: f32[16,128], index: 3, kind: output, shape index: {}]  }
   0x1   :  { %s16_s13 = sshll.u32 %s254_s12, 4  ;;  %s230_s16 = scalar_lea.hbm %s305_s1, 2048  ;;  %s17_s13 = int_to_ptr.vmem [resolvable:$true] %s16_s13 }
   0x2   :  { %p231_p0 = scmp.ne.s32.totalorder %s305_s1, %s230_s16  ;;  %p234_p1 = scmp.lt.u32.totalorder %s230_s16, %s305_s1 }
   0x4   :  { %p236_p2 = pnand %p234_p1, %p231_p0 }
   0x6   :  { %239 = shalt.err (!%p236_p2)
}
   0x7   :  { %s240_s21 = scalar_lea.vmem %s17_s13, 2048  ;;  %p245_p4 = scmp.lt.s32.totalorder %s17_s13, %s17_s13 }
   0x8   :  { %p241_p3 = scmp.ne.s32.totalorder %s17_s13, %s240_s21  ;;  %p246_p5 = scmp.lt.s32.totalorder %s240_s21, %s240_s21 }
   0xa   :  { %p247_p6 = por %p246_p5, %p245_p4 }
   0xc   :  { %p248_p7 = pnand %p247_p6, %p241_p3 }
   0xe   :  { %251 = shalt.err (!%p248_p7)
}
   0xf   :  { %s255_s22 = smov 128   ;;  %s256_s23 = smov 8  }
  0x10   :  { %22 = dma.hbm_to_vmem [thread:$0]  %s305_s1, 2048, %s17_s13, [#allocation3], %s255_s22, %s255_s22, %s256_s23  }
  0x11   :  { %252 = dma.done.wait [#allocation3], 2048  }
  0x12   :  { %253 = vsyncadd [#allocation3], 4294965248  ;;  %v30_v0 = vld [vmem:[#allocation2] sm:$0xff]  ;;  %v31_v1 = vld [vmem:[#allocation2 + $0x8] sm:$0xff] }
  0x13   :  { %v32_v2 = vld [vmem:[#allocation2 + $0x10] sm:$0xff]  ;;  %v191_v3 = vpack.c.bf16 %v31_v1, %v30_v0  ;;  %v33_v4 = vld [vmem:[#allocation2 + $0x18] sm:$0xff]  ;;  %v34_v6 = vld [vmem:[#allocation2 + $0x20] sm:$0xff] }
  0x14   :  { %v195_v5 = vpack.c.bf16 %v33_v4, %v32_v2  ;;  %v35_v7 = vld [vmem:[#allocation2 + $0x28] sm:$0xff]  ;;  %v28_v9 = vld [vmem:[%s304_s0] sm:$0xff]  ;;  %v36_v10 = vld [vmem:[#allocation2 + $0x30] sm:$0xff] }
  0x15   :  { %192 = vmatprep.subr.bf16.mxu0 %v191_v3  ;;  %v199_v8 = vpack.c.bf16 %v35_v7, %v34_v6  ;;  %v37_v11 = vld [vmem:[#allocation2 + $0x38] sm:$0xff]  ;;  %188 = vmatprep.mubr.f32.mxu0 %v28_v9  ;;  %v38_v13 = vld [vmem:[#allocation2 + $0x40] sm:$0xff]  ;;  %v39_v14 = vld [vmem:[#allocation2 + $0x48] sm:$0xff] }
  0x16   :  { %194 = vmatpush3.bf16.msra.mxu0 %v191_v3  ;;  %v203_v12 = vpack.c.bf16 %v37_v11, %v36_v10  ;;  %v207_v15 = vpack.c.bf16 %v39_v14, %v38_v13  ;;  %v40_v16 = vld [vmem:[#allocation2 + $0x50] sm:$0xff]  ;;  %v41_v17 = vld [vmem:[#allocation2 + $0x58] sm:$0xff]  ;;  %v42_v19 = vld [vmem:[#allocation2 + $0x60] sm:$0xff] }
  0x17   :  { %196 = vmatprep.subr.bf16.mxu0 %v195_v5  ;;  %v211_v18 = vpack.c.bf16 %v41_v17, %v40_v16  ;;  %v43_v20 = vld [vmem:[#allocation2 + $0x68] sm:$0xff]  ;;  %v44_v22 = vld [vmem:[#allocation2 + $0x70] sm:$0xff]  ;;  %v45_v23 = vld [vmem:[#allocation2 + $0x78] sm:$0xff] }
  0x18   :  { %v215_v21 = vpack.c.bf16 %v43_v20, %v42_v19  ;;  %v219_v24 = vpack.c.bf16 %v45_v23, %v44_v22  ;;  %v29_v25 = vld [vmem:[%s304_s0 + $0x8] sm:$0xff]  ;;  %v137_v26 = vld [vmem:[%s306_s2] ss:$0 sm:$0xff] }
  0x1a   :  { %198 = vmatpush3.bf16.msra.mxu0 %v195_v5 }
  0x1b   :  { %200 = vmatprep.subr.bf16.mxu0 %v199_v8 }
  0x1e   :  { %202 = vmatpush3.bf16.msra.mxu0 %v199_v8 }
  0x1f   :  { %204 = vmatprep.subr.bf16.mxu0 %v203_v12 }
  0x22   :  { %206 = vmatpush3.bf16.msra.mxu0 %v203_v12 }
  0x23   :  { %208 = vmatprep.subr.bf16.mxu0 %v207_v15 }
  0x26   :  { %210 = vmatpush3.bf16.msra.mxu0 %v207_v15 }
  0x27   :  { %212 = vmatprep.subr.bf16.mxu0 %v211_v18 }
  0x2a   :  { %214 = vmatpush3.bf16.msra.mxu0 %v211_v18 }
  0x2b   :  { %216 = vmatprep.subr.bf16.mxu0 %v215_v21 }
  0x2e   :  { %218 = vmatpush3.bf16.msra.mxu0 %v215_v21 }
  0x2f   :  { %220 = vmatprep.subr.bf16.mxu0 %v219_v24 }
  0x32   :  { %222 = vmatpush3.bf16.msra.mxu0 %v219_v24 }
  0x35   :  { %189 = vmatmul.mubr.f32.vlgmr.msra.gmra.mrb[0].mxu0 %v29_v25 }
 0x108   :  { %v190_v27 = vpop.f32.mrb[0].mxu0 }
 0x109   :  { %v125_v28 = vadd.f32 %v190_v27, %v137_v26  ;;  %v119_v29 = vpop.f32.mrb[1].mxu0 }
 0x10a   :  { %v120_v30 = vadd.f32 %v137_v26, %v119_v29 }
 0x10b   :  { %226 = vtanh.f32 %v125_v28 }
 0x10c   :  { %228 = vtanh.f32 %v120_v30 }
 0x115   :  { %v227_v31 = vpop.eup %226 }
 0x116   :  { %v229_v32 = vpop.eup %228  ;;  %131 = vst [vmem:[%s307_s3 + $0x8] sm:$0xff] %v227_v31 }
 0x117   :  { %130 = vst [vmem:[%s307_s3] sm:$0xff] %v229_v32 }
 0x118   :  { %136 = vsyncpa [#allocation3], 1 }

</bundles_post_ra>
